<compile_context>
chip_gen: v7x
topology: tpu7x:2x2x1
jax: 0.10.0
libtpu: 0.0.40
codegen_flags: <defaults>
</compile_context>

<pallas_src>
import functools

import jax
import jax.numpy as jnp
from jax.experimental import pallas as pl
from jax.experimental.pallas import tpu as pltpu


# --------------------------------------------------------------------------
# helpers
# --------------------------------------------------------------------------
def _round_up(x, m):
    return ((x + m - 1) // m) * m


def _pick_tile(n_pad, cap):
    # largest multiple of 128 that is <= cap and divides n_pad (n_pad % 128 == 0)
    t = min(cap, n_pad)
    while n_pad % t:
        t -= 128
    return t


def _vmem_limit_bytes():
    # Generation-aware scoped-VMEM budget: ~80% of physical, capped at 100 MiB.
    #   v5e / v6e : 128 MiB physical -> ~100 MiB
    #   v7x       :  64 MiB physical -> ~51 MiB (leaves headroom for Mosaic scratch)
    try:
        cap = pltpu.get_tpu_info().vmem_capacity_bytes
    except Exception:
        cap = 64 << 20
    return int(min(int(cap * 0.8), 100 << 20))


# --------------------------------------------------------------------------
# Kernel 1: edge MLP  (Linear -> ReLU -> Linear -> Sigmoid), edges on lanes
#   ex_ref : (Fe, TE)   edge features, edges along lanes
#   w1t    : (H1, Fe)   first linear, transposed (resident across grid)
#   b1     : (H1, 1)
#   w2     : (H1, 1)    scalar head
#   b2     : (1, 1)
#   out    : (1, TE)    lane-dense per-edge weights
# --------------------------------------------------------------------------
def edge_mlp_kernel(ex_ref, w1t_ref, b1_ref, w2_ref, b2_ref, out_ref):
    h = jnp.dot(w1t_ref[...], ex_ref[...], preferred_element_type=jnp.float32)
    h = jnp.maximum(h + b1_ref[...], 0.0)                               # (H1, TE)
    # scalar head: VPU multiply + sublane reduce (no 1-wide MXU pass)
    z = jnp.sum(h * w2_ref[...], axis=0, keepdims=True) + b2_ref[...]   # (1, TE)
    # numerically-stable EXACT sigmoid (edge weights feed D^-1/2, keep precise)
    ez = jnp.exp(-jnp.abs(z))
    num = jnp.where(z >= 0.0, 1.0, ez)
    out_ref[...] = num / (1.0 + ez)


def edge_mlp(edge_x, w1, b1, w2, b2):
    f32 = jnp.float32
    E, Fe = edge_x.shape
    H1 = w1.shape[1]
    # wide lane tiles amortize per-grid-step overhead; VMEM cost is only Fe rows
    tile_e = min(4096, _round_up(E, 128))
    e_pad = _round_up(E, tile_e)

    ex_t = jnp.pad(edge_x.astype(f32).T, ((0, 0), (0, e_pad - E)))       # (Fe, E_pad)
    w1t = w1.T.astype(f32)                                               # (H1, Fe)
    b1c = b1.reshape(-1, 1).astype(f32)                                  # (H1, 1)
    w2c = w2.reshape(-1, 1).astype(f32)                                  # (H1, 1)
    b2s = b2.reshape(1, 1).astype(f32)                                   # (1, 1)

    out = pl.pallas_call(
        edge_mlp_kernel,
        out_shape=jax.ShapeDtypeStruct((1, e_pad), f32),
        grid=(e_pad // tile_e,),
        in_specs=[
            pl.BlockSpec((Fe, tile_e), lambda e: (0, e)),   # stream edge tiles
            pl.BlockSpec((H1, Fe), lambda e: (0, 0)),       # resident weights
            pl.BlockSpec((H1, 1), lambda e: (0, 0)),
            pl.BlockSpec((H1, 1), lambda e: (0, 0)),
            pl.BlockSpec((1, 1), lambda e: (0, 0)),
        ],
        out_specs=pl.BlockSpec((1, tile_e), lambda e: (0, e)),
        compiler_params=pltpu.CompilerParams(
            dimension_semantics=("parallel",),
            vmem_limit_bytes=_vmem_limit_bytes(),
        ),
    )(ex_t, w1t, b1c, w2c, b2s)
    return out[0, :E]                                                    # (E,)


# --------------------------------------------------------------------------
# Kernel 2: one GCN layer on a pre-normalized bf16 adjacency, row/col tiled.
#   out[i] = (sum_k A[i, k] @ (X[k] @ W)) + b   [, ReLU]
#   grid = (row_tiles "parallel", k_tiles "arbitrary"); f32 VMEM accumulator.
# --------------------------------------------------------------------------
def gcn_layer_kernel(a_ref, x_ref, w_ref, b_ref, out_ref, acc_ref, *, apply_relu):
    k = pl.program_id(1)

    @pl.when(k == 0)
    def _():
        acc_ref[...] = jnp.zeros_like(acc_ref)

    # (tk, H) slab of X @ W for this column tile (tiny: F, H <= 128 -> recompute)
    xw = jnp.dot(x_ref[...], w_ref[...], preferred_element_type=jnp.float32)
    # bf16 operands on the MXU, f32 accumulation; all elementwise math stays f32
    acc_ref[...] += jnp.dot(a_ref[...], xw.astype(jnp.bfloat16),
                            preferred_element_type=jnp.float32)

    @pl.when(k == pl.num_programs(1) - 1)
    def _():
        r = acc_ref[...] + b_ref[...]
        if apply_relu:
            r = jnp.maximum(r, 0.0)
        out_ref[...] = r


def gcn_layer(a_bf16, x, w, b, *, apply_relu, tm, tk, out_width=128):
    """x: (n_pad, Fi) f32, a_bf16: (n_pad, n_pad) bf16, w: (fin, fout), b: (1, fout)."""
    f32 = jnp.float32
    n_pad = a_bf16.shape[0]
    Fi = x.shape[1]
    h_pad = out_width                                       # lane-dense output width

    w_p = jnp.zeros((Fi, h_pad), f32).at[: w.shape[0], : w.shape[1]].set(w.astype(f32))
    b_p = jnp.zeros((1, h_pad), f32).at[:, : b.size].set(b.reshape(1, -1).astype(f32))

    return pl.pallas_call(
        functools.partial(gcn_layer_kernel, apply_relu=apply_relu),
        out_shape=jax.ShapeDtypeStruct((n_pad, h_pad), f32),
        grid_spec=pltpu.PrefetchScalarGridSpec(
            num_scalar_prefetch=0,
            grid=(n_pad // tm, n_pad // tk),
            in_specs=[
                pl.BlockSpec((tm, tk), lambda i, k: (i, k)),      # stream A panels
                pl.BlockSpec((tk, Fi), lambda i, k: (k, 0)),      # matching X rows
                pl.BlockSpec((Fi, h_pad), lambda i, k: (0, 0)),   # resident W
                pl.BlockSpec((1, h_pad), lambda i, k: (0, 0)),    # resident bias
            ],
            out_specs=pl.BlockSpec((tm, h_pad), lambda i, k: (i, 0)),
            scratch_shapes=[pltpu.VMEM((tm, h_pad), jnp.float32)],
        ),
        compiler_params=pltpu.CompilerParams(
            dimension_semantics=("parallel", "arbitrary"),
            vmem_limit_bytes=_vmem_limit_bytes(),
        ),
    )(a_bf16, x, w_p, b_p)


# --------------------------------------------------------------------------
# Full PDN forward
# --------------------------------------------------------------------------
def pdn_forward(x, edge_index, edge_x, params):
    f32 = jnp.float32
    N = x.shape[0]
    Fo = params["wg2"].shape[1]

    # per-edge scalar weights from the edge MLP (Pallas kernel, lane-dense)
    ew = edge_mlp(edge_x, params["w1"], params["b1"],
                  params["w2"], params["b2"])                            # (E,)

    # ---- normalized dense adjacency A_norm[target, source], built ONCE ----
    # TODO(synk): scatter-add has no clean Pallas TPU equivalent; for very large
    # sparse graphs replace this dense build + dense matmul with a sorted-edge
    # PrefetchScalarGridSpec row-tile accumulation kernel.
    src = edge_index[0]
    tgt = edge_index[1]
    is_loop = src == tgt
    off_w = jnp.where(is_loop, 0.0, ew)
    # PyG add_remaining_self_loops: nodes keep an existing self-loop weight,
    # every other node gets a self-loop of weight 1.0.
    diag = jnp.ones((N,), f32).at[jnp.where(is_loop, tgt, N)].set(ew, mode="drop")
    deg = diag + jnp.zeros((N,), f32).at[tgt].add(off_w)                 # O(E) degrees
    d = jnp.where(deg > 0.0, jax.lax.rsqrt(deg), 0.0)

    n_pad = _round_up(N, 128)
    nodes = jnp.arange(N, dtype=tgt.dtype)
    rows = jnp.concatenate([tgt, nodes])
    cols = jnp.concatenate([src, nodes])
    vals = jnp.concatenate([d[tgt] * off_w * d[src], d * diag * d])
    a_norm = jnp.zeros((n_pad, n_pad), f32).at[rows, cols].add(vals)
    a_bf16 = a_norm.astype(jnp.bfloat16)    # halve HBM traffic of the dominant term

    # ---- two tiled GCN layers; A streams in bf16 row panels both passes ----
    tm = _pick_tile(n_pad, 256)
    tk = _pick_tile(n_pad, 512)
    x_p = jnp.pad(x.astype(f32), ((0, n_pad - N), (0, 0)))

    h = gcn_layer(a_bf16, x_p, params["wg1"], params["bg1"],
                  apply_relu=True, tm=tm, tk=tk, out_width=128)
    # Dropout(p=0.5) between layers is identity in eval/inference mode.
    out = gcn_layer(a_bf16, h, params["wg2"], params["bg2"],
                    apply_relu=False, tm=tm, tk=tk, out_width=128)
    return out[:N, :Fo]


# --------------------------------------------------------------------------
# Pure-JAX reference (f32 throughout) for a sanity check
# --------------------------------------------------------------------------
def pdn_reference(x, edge_index, edge_x, params):
    f32 = jnp.float32
    N = x.shape[0]
    h = jnp.maximum(edge_x @ params["w1"] + params["b1"], 0.0)
    ew = jax.nn.sigmoid(h @ params["w2"] + params["b2"])[:, 0]
    src, tgt = edge_index[0], edge_index[1]
    is_loop = src == tgt
    off_w = jnp.where(is_loop, 0.0, ew)
    diag = jnp.ones((N,), f32).at[jnp.where(is_loop, tgt, N)].set(ew, mode="drop")
    A = jnp.zeros((N, N), f32).at[tgt, src].add(off_w) + jnp.diag(diag)
    deg = A.sum(axis=1)
    d = jnp.where(deg > 0.0, jax.lax.rsqrt(deg), 0.0)
    An = d[:, None] * A * d[None, :]
    h1 = jnp.maximum(An @ (x @ params["wg1"]) + params["bg1"], 0.0)
    return An @ (h1 @ params["wg2"]) + params["bg2"]


if __name__ == "__main__":
    # small, deterministic problem sizes consistent with the module defaults
    N, F_in, F_hid, F_out = 16, 8, 32, 4     # nodes / in_features / hids[0] / out_features
    Fe, pdn_hid, E = 6, 32, 40               # in_edge_features / pdn_hids / num edges

    key = jax.random.PRNGKey(0)
    ks = jax.random.split(key, 9)

    x = jax.random.normal(ks[0], (N, F_in), jnp.float32)
    edge_index = jax.random.randint(ks[1], (2, E), 0, N, dtype=jnp.int32)
    edge_x = jax.random.normal(ks[2], (E, Fe), jnp.float32)

    params = {
        # edge MLP: Linear(Fe, pdn_hid) -> ReLU -> Linear(pdn_hid, 1) -> Sigmoid
        "w1": 0.1 * jax.random.normal(ks[3], (Fe, pdn_hid), jnp.float32),
        "b1": jnp.zeros((1, pdn_hid), jnp.float32),
        "w2": 0.1 * jax.random.normal(ks[4], (pdn_hid, 1), jnp.float32),
        "b2": jnp.zeros((1, 1), jnp.float32),
        # GCNConv 1: F_in -> F_hid
        "wg1": 0.1 * jax.random.normal(ks[5], (F_in, F_hid), jnp.float32),
        "bg1": jnp.zeros((1, F_hid), jnp.float32),
        # GCNConv 2: F_hid -> F_out
        "wg2": 0.1 * jax.random.normal(ks[6], (F_hid, F_out), jnp.float32),
        "bg2": jnp.zeros((1, F_out), jnp.float32),
    }

    out = pdn_forward(x, edge_index, edge_x, params)
    out = jax.block_until_ready(out)
    assert out.shape == (N, F_out), out.shape
    assert jnp.all(jnp.isfinite(out))

    ref = jax.block_until_ready(pdn_reference(x, edge_index, edge_x, params))
    # tolerance covers bf16 quantization of A_norm / MXU operands (sigmoid is exact)
    assert jnp.allclose(out, ref, atol=1e-2, rtol=1e-2), float(jnp.abs(out - ref).max())

    print("KERNEL_OK")
</pallas_src>

<mosaic_0001>
module attributes {stable_mosaic.version = 11 : i64} {
  func.func @edge_mlp_kernel(%arg0: i32, %arg1: memref<6x128xf32, #tpu.memory_space<vmem>>, %arg2: memref<32x6xf32, #tpu.memory_space<vmem>>, %arg3: memref<32x1xf32, #tpu.memory_space<vmem>>, %arg4: memref<32x1xf32, #tpu.memory_space<vmem>>, %arg5: memref<1x1xf32, #tpu.memory_space<vmem>>, %arg6: memref<1x128xf32, #tpu.memory_space<vmem>>) attributes {dimension_semantics = [#tpu.dimension_semantics<parallel>], iteration_bounds = array<i64: 1>, scalar_prefetch = 0 : i64, scratch_operands = 0 : i64, tpu.core_type = #tpu.core_type<tc>, window_params = [{transform_indices = @transform_0, window_bounds = array<i64: 6, 128>}, {pipeline_mode = #tpu.pipeline_mode<synchronous>, transform_indices = @transform_1, window_bounds = array<i64: 32, 6>}, {pipeline_mode = #tpu.pipeline_mode<synchronous>, transform_indices = @transform_2, window_bounds = array<i64: 32, 1>}, {pipeline_mode = #tpu.pipeline_mode<synchronous>, transform_indices = @transform_3, window_bounds = array<i64: 32, 1>}, {pipeline_mode = #tpu.pipeline_mode<synchronous>, transform_indices = @transform_4, window_bounds = array<i64: 1, 1>}, {transform_indices = @transform_5, window_bounds = array<i64: 1, 128>}]} {
    %c0 = arith.constant 0 : index
    %c0_0 = arith.constant 0 : index
    %0 = vector.load %arg2[%c0, %c0_0] : memref<32x6xf32, #tpu.memory_space<vmem>>, vector<32x6xf32>
    %c0_1 = arith.constant 0 : index
    %c0_2 = arith.constant 0 : index
    %1 = vector.load %arg1[%c0_1, %c0_2] : memref<6x128xf32, #tpu.memory_space<vmem>>, vector<6x128xf32>
    %cst = arith.constant dense<0.000000e+00> : vector<32x128xf32>
    %2 = tpu.matmul %0, %1, %cst {dimension_numbers = #tpu.dot_dimension_numbers<[1], [0], [0], [1], [0, 0, 1, 1], [], []>} : vector<32x6xf32>, vector<6x128xf32>, vector<32x128xf32> -> vector<32x128xf32>
    %c0_3 = arith.constant 0 : index
    %c0_4 = arith.constant 0 : index
    %3 = vector.load %arg3[%c0_3, %c0_4] : memref<32x1xf32, #tpu.memory_space<vmem>>, vector<32x1xf32>
    %4 = vector.broadcast %3 : vector<32x1xf32> to vector<32x128xf32>
    %5 = arith.addf %2, %4 : vector<32x128xf32>
    %cst_5 = arith.constant 0.000000e+00 : f32
    %6 = vector.broadcast %cst_5 : f32 to vector<32x128xf32>
    %7 = arith.maximumf %5, %6 : vector<32x128xf32>
    %c0_6 = arith.constant 0 : index
    %c0_7 = arith.constant 0 : index
    %8 = vector.load %arg4[%c0_6, %c0_7] : memref<32x1xf32, #tpu.memory_space<vmem>>, vector<32x1xf32>
    %9 = vector.broadcast %8 : vector<32x1xf32> to vector<32x128xf32>
    %10 = arith.mulf %7, %9 : vector<32x128xf32>
    %cst_8 = arith.constant dense<0.000000e+00> : vector<128xf32>
    %11 = vector.multi_reduction <add>, %10, %cst_8 [0] : vector<32x128xf32> to vector<128xf32>
    %12 = vector.shape_cast %11 : vector<128xf32> to vector<1x128xf32>
    %c0_9 = arith.constant 0 : index
    %c0_10 = arith.constant 0 : index
    %13 = vector.load %arg5[%c0_9, %c0_10] : memref<1x1xf32, #tpu.memory_space<vmem>>, vector<1x1xf32>
    %14 = vector.broadcast %13 : vector<1x1xf32> to vector<1x128xf32>
    %15 = arith.addf %12, %14 : vector<1x128xf32>
    %16 = math.absf %15 : vector<1x128xf32>
    %cst_11 = arith.constant 0.000000e+00 : f32
    %17 = vector.broadcast %cst_11 : f32 to vector<1x128xf32>
    %18 = arith.subf %17, %16 : vector<1x128xf32>
    %19 = math.exp %18 : vector<1x128xf32>
    %cst_12 = arith.constant 0.000000e+00 : f32
    %20 = vector.broadcast %cst_12 : f32 to vector<1x128xf32>
    %21 = arith.cmpf oge, %15, %20 : vector<1x128xf32>
    %cst_13 = arith.constant 1.000000e+00 : f32
    %22 = vector.broadcast %cst_13 : f32 to vector<1x128xf32>
    %23 = arith.select %21, %22, %19 : vector<1x128xi1>, vector<1x128xf32>
    %cst_14 = arith.constant 1.000000e+00 : f32
    %24 = vector.broadcast %cst_14 : f32 to vector<1x128xf32>
    %25 = arith.addf %24, %19 : vector<1x128xf32>
    %26 = arith.divf %23, %25 : vector<1x128xf32>
    %c0_15 = arith.constant 0 : index
    %c0_16 = arith.constant 0 : index
    %27 = vector.load %arg6[%c0_15, %c0_16] : memref<1x128xf32, #tpu.memory_space<vmem>>, vector<1x128xf32>
    tpu.vector_store %arg6[%c0_15, %c0_16], %26 {strides = array<i32>} : memref<1x128xf32, #tpu.memory_space<vmem>>, vector<1x128xf32>,
    return
  }
  func.func @transform_0(%arg0: i32) -> (i32, i32) {
    %c0_i32 = arith.constant 0 : i32
    %c0_i32_0 = arith.constant 0 : i32
    return %c0_i32, %arg0 : i32, i32
  }
  func.func @transform_1(%arg0: i32) -> (i32, i32) {
    %c0_i32 = arith.constant 0 : i32
    %c0_i32_0 = arith.constant 0 : i32
    %c0_i32_1 = arith.constant 0 : i32
    return %c0_i32, %c0_i32_0 : i32, i32
  }
  func.func @transform_2(%arg0: i32) -> (i32, i32) {
    %c0_i32 = arith.constant 0 : i32
    %c0_i32_0 = arith.constant 0 : i32
    %c0_i32_1 = arith.constant 0 : i32
    return %c0_i32, %c0_i32_0 : i32, i32
  }
  func.func @transform_3(%arg0: i32) -> (i32, i32) {
    %c0_i32 = arith.constant 0 : i32
    %c0_i32_0 = arith.constant 0 : i32
    %c0_i32_1 = arith.constant 0 : i32
    return %c0_i32, %c0_i32_0 : i32, i32
  }
  func.func @transform_4(%arg0: i32) -> (i32, i32) {
    %c0_i32 = arith.constant 0 : i32
    %c0_i32_0 = arith.constant 0 : i32
    %c0_i32_1 = arith.constant 0 : i32
    return %c0_i32, %c0_i32_0 : i32, i32
  }
  func.func @transform_5(%arg0: i32) -> (i32, i32) {
    %c0_i32 = arith.constant 0 : i32
    %c0_i32_0 = arith.constant 0 : i32
    return %c0_i32, %arg0 : i32, i32
  }
}

</mosaic_0001>

<bundles_post_ra>
// kernel: tpu_custom_call.1
= control target key start
LH: loop header
LB: loop body
LE: loop exit
PB: predicated region body
PF: predicated region fallthrough
CT: control target
= control target key end

     0   :  { %s368_s0 = inlined_call_operand.vmem [shape: f32[6,128], index: 0, kind: input, shape index: {}]   ;;  %s369_s1 = inlined_call_operand.vmem [shape: f32[32,6], index: 1, kind: input, shape index: {}]   ;;  %s370_s2 = inlined_call_operand.vmem [shape: f32[32,1], index: 2, kind: input, shape index: {}]   ;;  %s371_s3 = inlined_call_operand.vmem [shape: f32[32,1], index: 3, kind: input, shape index: {}]   ;;  %s372_s4 = inlined_call_operand.<no memory space> [shape: f32[1,1], index: 4, kind: input, shape index: {}]   ;;  %s373_s5 = inlined_call_operand.hbm [shape: f32[1,128], index: 5, kind: output, shape index: {}]  }
   0x1   :  { %v10_v0 = vstv %s372_s4 }
   0x2   :  { %11 = vst [vmem:[#allocation2] sm:$0x1] %v10_v0 }
   0x3   :  { %v27_v1 = vld [vmem:[%s368_s0] sm:$0x3f]  ;;  %vm65_vm0 = vcmask 1045504   ;;  %vm52_vm1 = vcmask 48128   ;;  %v25_v3 = vld [vmem:[%s369_s1 + $0x10] sm:$0xff]  ;;  %v24_v4 = vld [vmem:[%s369_s1 + $0x8] sm:$0xff] }
   0x4   :  { %v23_v2 = vld [vmem:[%s369_s1] sm:$0xff]  ;;  %240 = vmatprep.subr.msk.mxu0 %vm65_vm0, %v27_v1  ;;  %248 = vmatprep.subr.msk.mxu1 %vm65_vm0, %v27_v1  ;;  %v26_v5 = vld [vmem:[%s369_s1 + $0x18] sm:$0xff]  ;;  %v30_v7 = vld [vmem:[%s370_s2 + $0x10] sm:$0xff] }
   0x5   :  { %241 = vmatpush3.msk.msra.mxu0 %vm65_vm0, %v27_v1  ;;  %249 = vmatpush3.msk.msra.mxu1 %vm65_vm0, %v27_v1  ;;  %v28_v6 = vld [vmem:[%s370_s2] sm:$0xff] }
   0x6   :  { %242 = vmatprep.mubr.msk.f32.mxu0 %vm52_vm1, %v23_v2  ;;  %245 = vmatprep.mubr.msk.f32.mxu1 %vm52_vm1, %v25_v3 }
   0x7   :  { %243 = vmatmul.mubr.msk.f32.vlgmr.msra.gmra.mrb[0].mxu0 %vm52_vm1, %v24_v4  ;;  %246 = vmatmul.mubr.msk.f32.vlgmr.msra.gmra.mrb[0].mxu1 %vm52_vm1, %v26_v5 }
   0x8   :  { %12 = vsyncpa [#allocation4], 0  ;;  %v282_v8 = vmov 0   ;;  %v29_v9 = vld [vmem:[%s370_s2 + $0x8] sm:$0xff]  ;;  %v31_v10 = vld [vmem:[%s370_s2 + $0x18] sm:$0xff]  ;;  %v201_v42 = vlaneseq  ;;  %s283_s2 = smov [#allocation3]  }
   0x9   :  { %252 = vset.pattern.permute.xlu0 %v282_v8  ;;  %253 = vset.pattern.permute.xlu1 %v282_v8  ;;  %v158_v11 = vld [vmem:[%s371_s3] sm:$0xff]  ;;  %v159_v12 = vld [vmem:[%s371_s3 + $0x8] sm:$0xff]  ;;  %v160_v13 = vld [vmem:[%s371_s3 + $0x10] sm:$0xff] }
   0xa   :  { %34 = vperm.xlu0 %252, %v28_v6   ;;  %44 = vperm.xlu1 %253, %v30_v7   ;;  %v161_v14 = vld [vmem:[%s371_s3 + $0x18] sm:$0xff]  ;;  %v195_v15 = vld [vmem:[#allocation2] sm:$0x1]  ;;  %v202_v45 = vshrl.u32 %v201_v42, 7  ;;  %s222_s3 = sshll.u32 %s283_s2, 4  ;;  %s223_s3 = int_to_ptr.vmem [resolvable:$true] %s222_s3 }
   0xb   :  { %s258_s18 = scalar_lea.vmem %s223_s3, 16  ;;  %s262_s19 = scalar_lea.vmem %s223_s3, 32 }
   0xc   :  { %v203_v48 = vsub.s32 0, %v202_v45  ;;  %p259_p0 = scmp.ne.s32.totalorder %s223_s3, %s258_s18  ;;  %p263_p1 = scmp.lt.s32.totalorder %s223_s3, %s223_s3 }
   0xd   :  { %p264_p2 = scmp.lt.s32.totalorder %s262_s19, %s258_s18 }
   0xe   :  { %39 = vperm.xlu0 %252, %v29_v9   ;;  %49 = vperm.xlu1 %253, %v31_v10  }
   0xf   :  { %p265_p3 = por %p264_p2, %p263_p1 }
  0x11   :  { %p266_p4 = pnand %p265_p3, %p259_p0 }
  0x12   :  { %164 = vperm.xlu0 %252, %v158_v11   ;;  %169 = vperm.xlu1 %253, %v159_v12  }
  0x16   :  { %174 = vperm.xlu0 %252, %v160_v13   ;;  %179 = vperm.xlu1 %253, %v161_v14  }
  0x1a   :  { %198 = vperm.xlu0 %252, %v195_v15  }
  0x89   :  { %v35_v16 = vpop.permute.xlu0 %34  ;;  %v45_v17 = vpop.permute.xlu1 %44 }
  0x8d   :  { %v40_v18 = vpop.permute.xlu0 %39  ;;  %v50_v19 = vpop.permute.xlu1 %49 }
  0x91   :  { %v165_v20 = vpop.permute.xlu0 %164  ;;  %v170_v29 = vpop.permute.xlu1 %169 }
  0x95   :  { %v175_v36 = vpop.permute.xlu0 %174  ;;  %v180_v39 = vpop.permute.xlu1 %179 }
  0x99   :  { %v199_v50 = vpop.permute.xlu0 %198 }
  0x9a   :  { %v204_v52 = vrot.slane %v199_v50, %v203_v48 }
  0xda   :  { %v244_v21 = vpop.f32.mrb[0].mxu0  ;;  %v247_v22 = vpop.f32.mrb[0].mxu1 }
  0xdb   :  { %v141_v23 = vadd.f32 %v244_v21, %v40_v18  ;;  %v135_v24 = vpop.f32.mrb[1].mxu0  ;;  %v145_v25 = vpop.f32.mrb[1].mxu1  ;;  %v151_v26 = vadd.f32 %v247_v22, %v50_v19 }
  0xdc   :  { %v136_v27 = vadd.f32 %v135_v24, %v35_v16  ;;  %v146_v28 = vadd.f32 %v145_v25, %v45_v17 }
  0xdd   :  { %v155_v30 = vmax.f32 %v141_v23, 0.0  ;;  %v157_v34 = vmax.f32 %v151_v26, 0.0 }
  0xde   :  { %v154_v31 = vmax.f32 %v136_v27, 0.0  ;;  %v156_v32 = vmax.f32 %v146_v28, 0.0 }
  0xdf   :  { %v183_v33 = vmul.f32 %v170_v29, %v155_v30  ;;  %v185_v40 = vmul.f32 %v180_v39, %v157_v34 }
  0xe0   :  { %v182_v35 = vmul.f32 %v165_v20, %v154_v31  ;;  %v184_v38 = vmul.f32 %v175_v36, %v156_v32 }
  0xe2   :  { %v186_v37 = vadd.f32 %v183_v33, %v182_v35 }
  0xe4   :  { %v187_v41 = vadd.f32 %v186_v37, %v184_v38 }
  0xe6   :  { %v188_v43 = vadd.f32 %v187_v41, %v185_v40 }
  0xe8   :  { %v189_v44 = vrot.slane %v188_v43, 4 }
  0xea   :  { %v190_v46 = vadd.f32 %v189_v44, %v188_v43 }
  0xec   :  { %v191_v47 = vrot.slane %v190_v46, 2 }
  0xee   :  { %v192_v49 = vadd.f32 %v191_v47, %v190_v46 }
  0xf0   :  { %v193_v51 = vrot.slane %v192_v49, 1 }
  0xf2   :  { %v194_v53 = vadd.f32 %v193_v51, %v192_v49 }
  0xf4   :  { %v205_v54 = vadd.f32 %v204_v52, %v194_v53 }
  0xf6   :  { %v206_v55 = vand.u32 2147483647, %v205_v54  ;;  %vm210_vm2 = vcmp.ge.f32.partialorder %v205_v54, 0.0 }
  0xf8   :  { %v207_v56 = vsub.f32 0.0, %v206_v55 }
  0xfa   :  { %v208_v57 = vmul.f32 1.442695, %v207_v56 }
  0xfc   :  { %254 = vpow2.f32 %v208_v57 }
 0x106   :  { %v255_v58 = vpop.eup %254 }
 0x107   :  { %v212_v59 = vadd.f32 1.0, %v255_v58  ;;  %v211_v61 = vsel %vm210_vm2, 1.0, %v255_v58 }
 0x109   :  { %256 = vrcp.f32 %v212_v59 }
 0x113   :  { %v257_v60 = vpop.eup %256 }
 0x114   :  { %v214_v62 = vmul.f32 %v257_v60, %v211_v61 }
 0x116   :  { %215 = vst [vmem:[#allocation3] sm:$0x1] %v214_v62 }
 0x117   :  { %269 = shalt.err (!%p266_p4)
}
 0x118   :  { %s270_s22 = scalar_lea.hbm %s373_s5, 16 }
 0x119   :  { %p271_p5 = scmp.ne.s32.totalorder %s373_s5, %s270_s22  ;;  %p274_p6 = scmp.lt.u32.totalorder %s270_s22, %s373_s5 }
 0x11b   :  { %p276_p7 = pnand %p274_p6, %p271_p5 }
 0x11d   :  { %279 = shalt.err (!%p276_p7)
}
 0x11e   :  { %225 = dma.vmem_to_hbm [thread:$0]  %s223_s3, 16, %s373_s5, [#allocation4]  }
 0x11f   :  { %280 = dma.done.wait [#allocation4], 16  }
 0x120   :  { %281 = vsyncadd [#allocation4], 4294967280 }
 0x121   :  { %229 = vsyncpa [#allocation4], 1 }

</bundles_post_ra>
